<compile_context>
chip_gen: v7x
topology: tpu7x:2x2x1
jax: 0.10.0
libtpu: 0.0.40
codegen_flags: <defaults>
</compile_context>

<pallas_src>
import jax
import jax.numpy as jnp
import numpy as np
from jax import lax
from jax.experimental import pallas as pl
from jax.experimental.pallas import tpu as pltpu


def _round_up(x: int, m: int) -> int:
    return ((x + m - 1) // m) * m


def _select_edge_tile(E: int, H: int, *, max_tile: int = 8192,
                      vmem_budget: int = 40 * 1024 * 1024) -> int:
    """Pick the edge-tile size (sublane dim of every per-edge block)."""
    e8 = _round_up(max(E, 1), 8)
    if e8 <= 1024:
        # Tiny problem: one full-extent block; ~0.35us per-step overhead would
        # dominate any benefit from splitting across grid steps.
        return e8
    # Double-buffered f32 bytes that scale with the tile:
    #   z1 input (2H) + z2 output (H) + z3 output (1).
    bytes_per_edge = 2 * (2 * H + H + 1) * 4
    cap = min(max_tile, vmem_budget // bytes_per_edge)
    cap = max(128, (cap // 128) * 128)
    # Aim for ~8 grid steps (keeps both v7x TensorCores fed through the
    # "parallel" grid axis) but never drop below 512 edges per tile so DMAs
    # stay long enough to amortize per-step overhead.
    te = _round_up((e8 + 7) // 8, 128)
    return int(min(max(te, 512), cap))


def edge_decoder_kernel(z1_ref, w1_ref, b1_ref, w2_ref, b2_ref,
                        z3_ref, z2_ref):
    z1 = z1_ref[...]                                           # (te, 2H)
    # lin1 + relu: single K=2H MXU matmul with f32 accumulation.
    z2 = jnp.maximum(
        jnp.dot(z1, w1_ref[...], preferred_element_type=jnp.float32)
        + b1_ref[...], 0.0)                                    # (te, H)
    z2_ref[...] = z2
    # lin2 as a lane-dense (1, te) row: contract over H with the RHS consumed
    # transposed by the MXU (no explicit z2.T relayout temp).
    z3_ref[...] = lax.dot_general(
        w2_ref[...], z2,
        dimension_numbers=(((1,), (1,)), ((), ())),
        preferred_element_type=jnp.float32) + b2_ref[0, 0]


def edge_decoder_pallas(z_author, z_hotel, edge_label_index, w1, b1, w2, b2,
                        *, edge_tile=None):
    """EdgeDecoder forward.

    z_author: (num_author, H) f32 ; z_hotel: (num_hotel, H) f32
    edge_label_index: (2, E) int32
    w1: (2H, H) pre-transposed lin1 weight ; b1: (H,)
    w2: (H, 1)  pre-transposed lin2 weight ; b2: (1,)
    edge_tile: None = auto (VMEM-budget derived); an int overrides it (must be
      a multiple of 128 unless it already covers every edge in one block).
    Returns (z3_flat, (z1, z2)) matching the PyTorch module.
    """
    H = z_author.shape[-1]
    assert w1.shape == (2 * H, H) and w2.shape == (H, 1)
    row = edge_label_index[0].astype(jnp.int32)
    col = edge_label_index[1].astype(jnp.int32)
    E = int(row.shape[0])

    e8 = _round_up(E, 8)
    if edge_tile is None:
        te = _select_edge_tile(E, H)
    elif edge_tile >= e8:
        te = e8
    else:
        assert edge_tile % 128 == 0, "edge_tile must be a multiple of 128"
        te = edge_tile
    E_pad = _round_up(E, te)

    # Pad only the int32 index vectors (cheap); the gather then directly
    # produces tile-aligned rows — no extra float pad pass in XLA.
    if E_pad != E:
        pad = E_pad - E
        row = jnp.pad(row, (0, pad))
        col = jnp.pad(col, (0, pad))

    # z1 is materialized exactly once (it is also a module output); XLA fuses
    # the two takes into the concat output. The kernel only reads it.
    z1 = jnp.concatenate(
        [jnp.take(z_author, row, axis=0), jnp.take(z_hotel, col, axis=0)],
        axis=-1)                                               # (E_pad, 2H)

    b1_2d = b1.reshape(1, H)
    w2_row = w2.reshape(1, H)        # (H, 1) -> (1, H): same row-major order
    b2_2d = b2.reshape(1, 1)

    grid = (E_pad // te,)

    # Double-buffered per-step block footprint (f32) + resident weight blocks,
    # with 2x headroom for Mosaic scratch; clamp so larger-H configs stay safe
    # on v7x (64 MiB physical VMEM, 32 MiB scoped default).
    block_bytes = 4 * (2 * te * 2 * H + 2 * te * H + 2 * te
                       + 2 * (2 * H * H + 3 * H + 1))
    vmem_limit = int(min(48 * 2 ** 20, max(8 * 2 ** 20, 2 * block_bytes)))

    z3_row, z2 = pl.pallas_call(
        edge_decoder_kernel,
        out_shape=(
            jax.ShapeDtypeStruct((1, E_pad), jnp.float32),     # z3 (lane-dense)
            jax.ShapeDtypeStruct((E_pad, H), jnp.float32),     # z2
        ),
        grid_spec=pltpu.PrefetchScalarGridSpec(
            num_scalar_prefetch=0,
            grid=grid,
            in_specs=[
                pl.BlockSpec((te, 2 * H), lambda i: (i, 0)),   # z1
                pl.BlockSpec((2 * H, H), lambda i: (0, 0)),    # w1 (full)
                pl.BlockSpec((1, H), lambda i: (0, 0)),        # b1
                pl.BlockSpec((1, H), lambda i: (0, 0)),        # w2 row
                pl.BlockSpec(memory_space=pltpu.MemorySpace.SMEM),  # b2 scalar
            ],
            out_specs=[
                pl.BlockSpec((1, te), lambda i: (0, i)),       # z3 row
                pl.BlockSpec((te, H), lambda i: (i, 0)),       # z2
            ],
        ),
        compiler_params=pltpu.CompilerParams(
            dimension_semantics=("parallel",),
            vmem_limit_bytes=vmem_limit),
    )(z1, w1, b1_2d, w2_row, b2_2d)

    z3_flat = z3_row[0, :E]
    if E_pad != E:
        return z3_flat, (z1[:E], z2[:E])
    return z3_flat, (z1, z2)


def _reference(z_author, z_hotel, edge_label_index, w1, b1, w2, b2):
    row, col = edge_label_index[0], edge_label_index[1]
    z1 = jnp.concatenate([z_author[row], z_hotel[col]], axis=-1)
    z2 = jnp.maximum(z1 @ w1 + b1, 0.0)
    z3 = z2 @ w2 + b2
    return z3.reshape(-1), z1, z2


def _check(z_author, z_hotel, eli, w1, b1, w2, b2, **kw):
    z3_flat, (z1, z2) = edge_decoder_pallas(z_author, z_hotel, eli,
                                            w1, b1, w2, b2, **kw)
    jax.block_until_ready((z3_flat, z1, z2))
    r3, r1, r2 = _reference(z_author, z_hotel, eli, w1, b1, w2, b2)
    assert z3_flat.shape == r3.shape
    np.testing.assert_allclose(np.asarray(z1), np.asarray(r1),
                               atol=1e-5, rtol=1e-5)
    np.testing.assert_allclose(np.asarray(z2), np.asarray(r2),
                               atol=1e-5, rtol=1e-5)
    np.testing.assert_allclose(np.asarray(z3_flat), np.asarray(r3),
                               atol=1e-5, rtol=1e-5)


if __name__ == "__main__":
    key = jax.random.PRNGKey(0)
    H = 32            # hidden_channels

    (k1, k2, k3, k4, k5, k6, k7, k8,
     k9, k10, k11, k12) = jax.random.split(key, 12)

    # Parameters: Linear weights stored pre-transposed as (in, out).
    w1 = (jax.random.normal(k5, (2 * H, H), dtype=jnp.float32)
          / jnp.sqrt(2.0 * H))
    b1 = jax.random.normal(k6, (H,), dtype=jnp.float32) * 0.01
    w2 = jax.random.normal(k7, (H, 1), dtype=jnp.float32) / jnp.sqrt(1.0 * H)
    b2 = jax.random.normal(k8, (1,), dtype=jnp.float32) * 0.01

    # --- Test 1: tiny shapes (single full-extent block) ----------------------
    n_author, n_hotel, E = 6, 5, 8
    z_author = jax.random.normal(k1, (n_author, H), dtype=jnp.float32)
    z_hotel = jax.random.normal(k2, (n_hotel, H), dtype=jnp.float32)
    eli = jnp.stack([
        jax.random.randint(k3, (E,), 0, n_author),
        jax.random.randint(k4, (E,), 0, n_hotel),
    ]).astype(jnp.int32)
    _check(z_author, z_hotel, eli, w1, b1, w2, b2)

    # --- Test 2: explicit tile override -> tiling + index padding + truncate -
    n_author2, n_hotel2, E2 = 40, 37, 300
    z_author2 = jax.random.normal(k9, (n_author2, H), dtype=jnp.float32)
    z_hotel2 = jax.random.normal(k10, (n_hotel2, H), dtype=jnp.float32)
    eli2 = jnp.stack([
        jax.random.randint(k3, (E2,), 0, n_author2),
        jax.random.randint(k4, (E2,), 0, n_hotel2),
    ]).astype(jnp.int32)
    _check(z_author2, z_hotel2, eli2, w1, b1, w2, b2, edge_tile=128)

    # --- Test 3: auto tile selection with a multi-step parallel grid ---------
    n_author3, n_hotel3, E3 = 64, 48, 2000
    z_author3 = jax.random.normal(k11, (n_author3, H), dtype=jnp.float32)
    z_hotel3 = jax.random.normal(k12, (n_hotel3, H), dtype=jnp.float32)
    eli3 = jnp.stack([
        jax.random.randint(k3, (E3,), 0, n_author3),
        jax.random.randint(k4, (E3,), 0, n_hotel3),
    ]).astype(jnp.int32)
    _check(z_author3, z_hotel3, eli3, w1, b1, w2, b2)

    print("KERNEL_OK")
</pallas_src>

<mosaic_0001>
module attributes {stable_mosaic.version = 11 : i64} {
  func.func @edge_decoder_kernel(%arg0: i32, %arg1: memref<8x64xf32, #tpu.memory_space<vmem>>, %arg2: memref<64x32xf32, #tpu.memory_space<vmem>>, %arg3: memref<1x32xf32, #tpu.memory_space<vmem>>, %arg4: memref<1x32xf32, #tpu.memory_space<vmem>>, %arg5: memref<1x1xf32, #tpu.memory_space<smem>>, %arg6: memref<1x8xf32, #tpu.memory_space<vmem>>, %arg7: memref<8x32xf32, #tpu.memory_space<vmem>>) attributes {dimension_semantics = [#tpu.dimension_semantics<parallel>], iteration_bounds = array<i64: 1>, scalar_prefetch = 0 : i64, scratch_operands = 0 : i64, tpu.core_type = #tpu.core_type<tc>, window_params = [{transform_indices = @transform_0, window_bounds = array<i64: 8, 64>}, {pipeline_mode = #tpu.pipeline_mode<synchronous>, transform_indices = @transform_1, window_bounds = array<i64: 64, 32>}, {pipeline_mode = #tpu.pipeline_mode<synchronous>, transform_indices = @transform_2, window_bounds = array<i64: 1, 32>}, {pipeline_mode = #tpu.pipeline_mode<synchronous>, transform_indices = @transform_3, window_bounds = array<i64: 1, 32>}, {transform_indices = @transform_4, window_bounds = array<i64: 1, 1>}, {transform_indices = @transform_5, window_bounds = array<i64: 1, 8>}, {transform_indices = @transform_6, window_bounds = array<i64: 8, 32>}]} {
    %c0 = arith.constant 0 : index
    %c0_0 = arith.constant 0 : index
    %0 = vector.load %arg1[%c0, %c0_0] : memref<8x64xf32, #tpu.memory_space<vmem>>, vector<8x64xf32>
    %c0_1 = arith.constant 0 : index
    %c0_2 = arith.constant 0 : index
    %1 = vector.load %arg2[%c0_1, %c0_2] : memref<64x32xf32, #tpu.memory_space<vmem>>, vector<64x32xf32>
    %cst = arith.constant dense<0.000000e+00> : vector<8x32xf32>
    %2 = tpu.matmul %0, %1, %cst {dimension_numbers = #tpu.dot_dimension_numbers<[1], [0], [0], [1], [0, 0, 1, 1], [], []>} : vector<8x64xf32>, vector<64x32xf32>, vector<8x32xf32> -> vector<8x32xf32>
    %c0_3 = arith.constant 0 : index
    %c0_4 = arith.constant 0 : index
    %3 = vector.load %arg3[%c0_3, %c0_4] : memref<1x32xf32, #tpu.memory_space<vmem>>, vector<1x32xf32>
    %4 = vector.broadcast %3 : vector<1x32xf32> to vector<8x32xf32>
    %5 = arith.addf %2, %4 : vector<8x32xf32>
    %cst_5 = arith.constant 0.000000e+00 : f32
    %6 = vector.broadcast %cst_5 : f32 to vector<8x32xf32>
    %7 = arith.maximumf %5, %6 : vector<8x32xf32>
    %c0_6 = arith.constant 0 : index
    %c0_7 = arith.constant 0 : index
    %8 = vector.load %arg7[%c0_6, %c0_7] : memref<8x32xf32, #tpu.memory_space<vmem>>, vector<8x32xf32>
    tpu.vector_store %arg7[%c0_6, %c0_7], %7 {strides = array<i32>} : memref<8x32xf32, #tpu.memory_space<vmem>>, vector<8x32xf32>,
    %c0_8 = arith.constant 0 : index
    %c0_9 = arith.constant 0 : index
    %9 = vector.load %arg4[%c0_8, %c0_9] : memref<1x32xf32, #tpu.memory_space<vmem>>, vector<1x32xf32>
    %cst_10 = arith.constant dense<0.000000e+00> : vector<1x8xf32>
    %10 = tpu.matmul %9, %7, %cst_10 {dimension_numbers = #tpu.dot_dimension_numbers<[1], [1], [0], [0], [0, 0, 1, 0], [], []>} : vector<1x32xf32>, vector<8x32xf32>, vector<1x8xf32> -> vector<1x8xf32>
    %c0_11 = arith.constant 0 : index
    %c0_12 = arith.constant 0 : index
    %11 = memref.load %arg5[%c0_11, %c0_12] : memref<1x1xf32, #tpu.memory_space<smem>>
    %12 = vector.broadcast %11 : f32 to vector<1x8xf32>
    %13 = arith.addf %10, %12 : vector<1x8xf32>
    %c0_13 = arith.constant 0 : index
    %c0_14 = arith.constant 0 : index
    %14 = vector.load %arg6[%c0_13, %c0_14] : memref<1x8xf32, #tpu.memory_space<vmem>>, vector<1x8xf32>
    tpu.vector_store %arg6[%c0_13, %c0_14], %13 {strides = array<i32>} : memref<1x8xf32, #tpu.memory_space<vmem>>, vector<1x8xf32>,
    return
  }
  func.func @transform_0(%arg0: i32) -> (i32, i32) {
    %c0_i32 = arith.constant 0 : i32
    %c0_i32_0 = arith.constant 0 : i32
    return %arg0, %c0_i32 : i32, i32
  }
  func.func @transform_1(%arg0: i32) -> (i32, i32) {
    %c0_i32 = arith.constant 0 : i32
    %c0_i32_0 = arith.constant 0 : i32
    %c0_i32_1 = arith.constant 0 : i32
    return %c0_i32, %c0_i32_0 : i32, i32
  }
  func.func @transform_2(%arg0: i32) -> (i32, i32) {
    %c0_i32 = arith.constant 0 : i32
    %c0_i32_0 = arith.constant 0 : i32
    %c0_i32_1 = arith.constant 0 : i32
    return %c0_i32, %c0_i32_0 : i32, i32
  }
  func.func @transform_3(%arg0: i32) -> (i32, i32) {
    %c0_i32 = arith.constant 0 : i32
    %c0_i32_0 = arith.constant 0 : i32
    %c0_i32_1 = arith.constant 0 : i32
    return %c0_i32, %c0_i32_0 : i32, i32
  }
  func.func @transform_4(%arg0: i32) -> (i32, i32) {
    %c0_i32 = arith.constant 0 : i32
    %c0_i32_0 = arith.constant 0 : i32
    %c0_i32_1 = arith.constant 0 : i32
    return %c0_i32, %c0_i32_0 : i32, i32
  }
  func.func @transform_5(%arg0: i32) -> (i32, i32) {
    %c0_i32 = arith.constant 0 : i32
    %c0_i32_0 = arith.constant 0 : i32
    return %c0_i32, %arg0 : i32, i32
  }
  func.func @transform_6(%arg0: i32) -> (i32, i32) {
    %c0_i32 = arith.constant 0 : i32
    %c0_i32_0 = arith.constant 0 : i32
    return %arg0, %c0_i32 : i32, i32
  }
}

</mosaic_0001>

<bundles_post_ra>
// kernel: tpu_custom_call.1
= control target key start
LH: loop header
LB: loop body
LE: loop exit
PB: predicated region body
PF: predicated region fallthrough
CT: control target
= control target key end

     0   :  { %13 = vsyncpa [#allocation4], 0  ;;  %v331_v3 = vmov 0.0|0.0   ;;  %vm332_vm0 = vmmov 0   ;;  %v333_v6 = vmov 0.0   ;;  %s431_s0 = inlined_call_operand.vmem [shape: f32[8,64], index: 0, kind: input, shape index: {}]   ;;  %s432_s1 = inlined_call_operand.vmem [shape: f32[64,32], index: 1, kind: input, shape index: {}]   ;;  %s433_s2 = inlined_call_operand.vmem [shape: f32[1,32], index: 2, kind: input, shape index: {}]   ;;  %s434_s3 = inlined_call_operand.vmem [shape: f32[1,32], index: 3, kind: input, shape index: {}]   ;;  %s435_s4 = inlined_call_operand.<no memory space> [shape: f32[1,1], index: 4, kind: input, shape index: {}]   ;;  %s436_s5 = inlined_call_operand.hbm [shape: f32[1,8], index: 5, kind: output, shape index: {0}]   ;;  %s437_s6 = inlined_call_operand.hbm [shape: f32[8,32], index: 6, kind: output, shape index: {1}]  }
   0x1   :  { %v26_v0 = vld [vmem:[%s432_s1] sm:$0xff]  ;;  %v27_v1 = vld [vmem:[%s432_s1 + $0x8] sm:$0xff]  ;;  %v28_v2 = vld [vmem:[%s432_s1 + $0x10] sm:$0xff]  ;;  %266 = vmatprep.subr.bf16.mxu0 %v331_v3  ;;  %258 = vmatprep.mubr.msk.f32.mxu0 %vm332_vm0, %v333_v6 }
   0x2   :  { %v267_v4 = vpack.c.bf16 %v27_v1, %v26_v0  ;;  %v29_v5 = vld [vmem:[%s432_s1 + $0x18] sm:$0xff]  ;;  %261 = vmatprep.subr.mxu1 %v333_v6  ;;  %263 = vmatprep.mubr.msk.f32.mxu1 %vm332_vm0, %v333_v6 }
   0x3   :  { %v270_v7 = vpack.c.bf16 %v29_v5, %v28_v2 }
   0x4   :  { %268 = vmatpush3.bf16.msra.mxu0 %v267_v4 }
   0x5   :  { %14 = vsyncpa [#allocation6], 0  ;;  %269 = vmatprep.subr.bf16.mxu0 %v331_v3  ;;  %v30_v8 = vld [vmem:[%s432_s1 + $0x20] sm:$0xff]  ;;  %v31_v9 = vld [vmem:[%s432_s1 + $0x28] sm:$0xff]  ;;  %vm41_vm1 = vcmask 523264   ;;  %vm116_vm2 = vcmask 261120  }
   0x6   :  { %v273_v10 = vpack.c.bf16 %v31_v9, %v30_v8  ;;  %v32_v11 = vld [vmem:[%s432_s1 + $0x30] sm:$0xff]  ;;  %v33_v12 = vld [vmem:[%s432_s1 + $0x38] sm:$0xff]  ;;  %v25_v14 = vld [vmem:[%s431_s0] sm:$0xff]  ;;  %s334_s18 = smov [#allocation5]  }
   0x7   :  { %v276_v13 = vpack.c.bf16 %v33_v12, %v32_v11  ;;  %v227_v15 = vld [vmem:[%s433_s2] ss:$0 sm:$0xff]  ;;  %s215_s0 = sshll.u32 %s334_s18, 4  ;;  %s216_s0 = int_to_ptr.vmem [resolvable:$true] %s215_s0 }
   0x8   :  { %271 = vmatpush3.bf16.msra.mxu0 %v270_v7  ;;  %v118_v20 = vld [vmem:[%s434_s3] sm:$0x1]  ;;  %s283_s19 = scalar_lea.vmem %s216_s0, 128  ;;  %p288_p1 = scmp.lt.s32.totalorder %s216_s0, %s216_s0 }
   0x9   :  { %272 = vmatprep.subr.bf16.mxu0 %v331_v3  ;;  %p284_p0 = scmp.ne.s32.totalorder %s216_s0, %s283_s19  ;;  %p289_p2 = scmp.lt.s32.totalorder %s283_s19, %s283_s19 }
   0xb   :  { %p290_p3 = por %p289_p2, %p288_p1 }
   0xc   :  { %274 = vmatpush3.bf16.msra.mxu0 %v273_v10 }
   0xd   :  { %275 = vmatprep.subr.bf16.mxu0 %v331_v3  ;;  %p291_p4 = pnand %p290_p3, %p284_p0 }
  0x10   :  { %277 = vmatpush3.bf16.msra.mxu0 %v276_v13 }
  0x13   :  { %259 = vmatmul.mubr.msk.f32.vlgmr.msra.gmra.mrb[0].mxu0 %vm41_vm1, %v25_v14 }
  0xe6   :  { %v111_v16 = vpop.f32.mrb[0].mxu0 }
  0xe7   :  { %v112_v17 = vadd.f32 %v227_v15, %v111_v16  ;;  %v260_v18 = vpop.f32.mrb[1].mxu0 }
  0xe9   :  { %v115_v19 = vmax.f32 %v112_v17, 0.0 }
  0xeb   :  { %262 = vmatpush3.xpose.msk.msra.mxu1 %vm116_vm2, %v115_v19  ;;  %117 = vst.msk [vmem:[#allocation5] sm:$0xff] %vm116_vm2, %v115_v19 }
  0xee   :  { %264 = vmatmul.mubr.msk.f32.vlgmr.msra.gmra.mrb[0].mxu1 %vm116_vm2, %v118_v20 }
  0xef   :  { %294 = shalt.err (!%p291_p4)
}
  0xf0   :  { %s295_s21 = scalar_lea.hbm %s437_s6, 128 }
  0xf1   :  { %p296_p5 = scmp.ne.s32.totalorder %s437_s6, %s295_s21  ;;  %p299_p6 = scmp.lt.u32.totalorder %s295_s21, %s437_s6 }
  0xf3   :  { %p301_p7 = pnand %p299_p6, %p296_p5 }
  0xf5   :  { %304 = shalt.err (!%p301_p7)
}
  0xf6   :  { %218 = dma.vmem_to_hbm [thread:$0]  %s216_s0, 128, %s437_s6, [#allocation6]   ;;  %v120_v21 = vstv %s435_s4  ;;  %vm197_vm3 = vcmask 57344  }
  0xf7   :  { %s335_s29 = smov [#allocation3]  }
  0xf8   :  { %s205_s30 = sshll.u32 %s335_s29, 4  ;;  %s206_s30 = int_to_ptr.vmem [resolvable:$true] %s205_s30 }
  0xf9   :  { %s305_s7 = scalar_lea.vmem %s206_s30, 16  ;;  %s309_s8 = scalar_lea.vmem %s206_s30, 32 }
  0xfa   :  { %p306_p8 = scmp.ne.s32.totalorder %s206_s30, %s305_s7  ;;  %p310_p9 = scmp.lt.s32.totalorder %s206_s30, %s206_s30 }
  0xfb   :  { %p311_p10 = scmp.lt.s32.totalorder %s309_s8, %s305_s7 }
  0xfd   :  { %p312_p11 = por %p311_p10, %p310_p9 }
  0xff   :  { %p313_p12 = pnand %p312_p11, %p306_p8 }
 0x1c1   :  { %v193_v22 = vpop.f32.mrb[0].mxu1 }
 0x1c2   :  { %v194_v23 = vadd.f32 %v193_v22, %v120_v21  ;;  %v265_v24 = vpop.f32.mrb[1].mxu1 }
 0x1c4   :  { %198 = vst.msk [vmem:[#allocation3] sm:$0x1] %vm197_vm3, %v194_v23 }
 0x1c5   :  { %316 = shalt.err (!%p313_p12)
}
 0x1c6   :  { %s317_s4 = scalar_lea.hbm %s436_s5, 16 }
 0x1c7   :  { %p318_p13 = scmp.ne.s32.totalorder %s436_s5, %s317_s4  ;;  %p321_p0 = scmp.lt.u32.totalorder %s317_s4, %s436_s5 }
 0x1c9   :  { %p323_p1 = pnand %p321_p0, %p318_p13 }
 0x1cb   :  { %326 = shalt.err (!%p323_p1)
}
 0x1cc   :  { %208 = dma.vmem_to_hbm [thread:$0]  %s206_s30, 16, %s436_s5, [#allocation4]  }
 0x1cd   :  { %327 = dma.done.wait [#allocation4], 16  }
 0x1ce   :  { %328 = vsyncadd [#allocation4], 4294967280 }
 0x1cf   :  { %329 = dma.done.wait [#allocation6], 128  }
 0x1d0   :  { %330 = vsyncadd [#allocation6], 4294967168 }
 0x1d1   :  { %225 = vsyncpa [#allocation4], 1 }
 0x1d2   :  { %226 = vsyncpa [#allocation6], 1 }

</bundles_post_ra>
